<compile_context>
chip_gen: v7x
topology: tpu7x:2x2x1
jax: 0.10.0
libtpu: 0.0.40
codegen_flags: <defaults>
</compile_context>

<pallas_src>
import functools

import numpy as np
import jax
import jax.numpy as jnp
from jax.experimental import pallas as pl
from jax.experimental.pallas import tpu as pltpu


# ---------------------------------------------------------------------------
# Host-side constant construction (conv weights + shifts + bilinear upsample
# folded into MXU-friendly matrices).
# ---------------------------------------------------------------------------

def _bilinear_matrix_align_corners(in_size: int, out_size: int) -> np.ndarray:
    """M (out,in): y = M @ x reproduces torch Upsample(mode='bilinear',
    align_corners=True) along one axis.  Built in float64 (torch computes the
    source coordinates in double)."""
    m = np.zeros((out_size, in_size), np.float64)
    if out_size == 1 or in_size == 1:
        m[:, 0] = 1.0
        return m
    scale = (in_size - 1) / (out_size - 1)
    for i in range(out_size):
        src = i * scale
        i0 = min(int(np.floor(src)), in_size - 1)
        i1 = min(i0 + 1, in_size - 1)
        f = src - i0
        m[i, i0] += 1.0 - f
        m[i, i1] += f
    return m


def _shift_matrix(n: int, s: int) -> np.ndarray:
    """S_s (n,n): (S_s @ v)[i] = v[i+s], zero outside [0,n) (conv zero-pad)."""
    m = np.zeros((n, n), np.float64)
    for i in range(n):
        j = i + s
        if 0 <= j < n:
            m[i, j] = 1.0
    return m


def _build_operands(conv_w, conv_b, C, H, W, compute_dtype):
    u_h = _bilinear_matrix_align_corners(H, 2 * H)                         # (2H, H)
    u_w = _bilinear_matrix_align_corners(W, 2 * W)                         # (2W, W)
    uh_shift = np.stack([u_h @ _shift_matrix(H, s) for s in (-1, 0, 1)])   # (3,2H,H)
    uwt = np.stack([(u_w @ _shift_matrix(W, s)).T for s in (-1, 0, 1)])    # (3,W,2W)

    w_cyx = conv_w.reshape(C, 3, 3).astype(jnp.float32)                    # [c,ky,kx]
    # G[kx, r, c, h] = sum_ky w[c,ky,kx] * (U_h @ S_{ky-1})[r, h]
    g = jnp.einsum("cyx,yrh->xrch", w_cyx,
                   jnp.asarray(uh_shift, jnp.float32),
                   precision=jax.lax.Precision.HIGHEST)
    g = g.reshape(6 * H, C * H).astype(compute_dtype)                      # (6H, C*H)
    uwt = jnp.asarray(uwt, jnp.float32)                                    # stage 2 f32
    bias = conv_b.reshape(1).astype(jnp.float32)
    return g, uwt, bias


# ---------------------------------------------------------------------------
# Kernel
# ---------------------------------------------------------------------------

def _fused_conv_upsample_kernel(x_ref, g_ref, uwt_ref, bias_ref, o_ref, *, B, H):
    # x_ref   : (B, C*H, W)    VMEM, compute dtype (bf16)   backbone features
    # g_ref   : (6H, C*H)      VMEM, compute dtype          fused conv+row-upsample
    # uwt_ref : (3, W, 2W)     VMEM, f32                    col-shifted col-upsample
    # bias_ref: (1,)           SMEM, f32                    conv bias
    # o_ref   : (B, 1, 2H, 2W) VMEM, f32
    two_h, two_w = o_ref.shape[2], o_ref.shape[3]
    # Hoisted (loop-invariant) broadcast of the scalar bias.
    bias_tile = jnp.full((two_h, two_w), bias_ref[0], jnp.float32)

    @pl.loop(0, B)
    def _(b):
        # Stage 1: ONE MXU matmul per batch element = channel contraction +
        # 3x3 row shifts (zero-padded) + row-wise bilinear x2 upsample.
        q = jnp.dot(g_ref[...], x_ref[b],
                    preferred_element_type=jnp.float32)        # (6H, W) f32
        # Stage 2: column-shifted column upsample, summed over the 3 kx taps.
        out = bias_tile
        out = out + jnp.dot(q[0 * H:2 * H], uwt_ref[0],
                            preferred_element_type=jnp.float32)
        out = out + jnp.dot(q[2 * H:4 * H], uwt_ref[1],
                            preferred_element_type=jnp.float32)
        out = out + jnp.dot(q[4 * H:6 * H], uwt_ref[2],
                            preferred_element_type=jnp.float32)
        o_ref[b, 0] = out.astype(o_ref.dtype)


# ---------------------------------------------------------------------------
# Wrapper: VMEM-aware batch blocking + pallas_call
# ---------------------------------------------------------------------------

def _vmem_budget_bytes():
    try:
        cap = int(pltpu.get_tpu_info().vmem_capacity_bytes)
        return (cap * 3) // 4        # ~96 MiB on v5e/v6e, ~48 MiB on v7x
    except Exception:
        return 48 * 1024 * 1024      # safe on every generation (v7x: 64 MiB/TC)


def _pick_batch_block(N, C, H, W, x_elt_bytes, const_bytes, budget):
    # Double-buffered feature block + f32 output block per batch element.
    per_b = 2 * (C * H * W * x_elt_bytes + 4 * H * W * 4)
    avail = max(budget - 2 * const_bytes - (4 << 20), per_b)
    max_b = max(1, avail // per_b)
    best = 1
    for b in range(1, N + 1):
        if N % b:
            continue
        if b > max_b:
            continue
        if N >= 2 and N // b < 2:
            # Keep >= 2 grid steps so the "parallel" axis can be sharded
            # across both v7x TensorCores.
            continue
        best = b
    return best


def residual_magnitude_forward(x, conv_w, conv_b, *, batch_block=None,
                               compute_dtype=jnp.bfloat16):
    """x: (N, C, H, W) backbone feature map (NCHW); conv_w: (1, C, 3, 3);
    conv_b: (1,).  Returns (N, 1, 2H, 2W) float32."""
    N, C, H, W = x.shape
    g, uwt, bias = _build_operands(conv_w, conv_b, C, H, W, compute_dtype)

    # Free (contiguous) host reshape: x_b arrives in exactly the (C*H, W)
    # sublane/lane layout stage 1 consumes.  bf16 halves the kernel's dominant
    # HBM read (ideally the backbone emits bf16 so the cast fuses upstream).
    x2 = x.reshape(N, C * H, W).astype(compute_dtype)

    x_elt = jnp.dtype(compute_dtype).itemsize
    const_bytes = g.size * g.dtype.itemsize + uwt.size * 4 + 128
    budget = _vmem_budget_bytes()
    B = batch_block if batch_block is not None else _pick_batch_block(
        N, C, H, W, x_elt, const_bytes, budget)
    assert N % B == 0, (N, B)

    kernel = functools.partial(_fused_conv_upsample_kernel, B=B, H=H)

    grid_spec = pltpu.PrefetchScalarGridSpec(
        num_scalar_prefetch=0,
        grid=(N // B,),
        in_specs=[
            pl.BlockSpec((B, C * H, W), lambda n: (n, 0, 0)),      # features
            pl.BlockSpec((6 * H, C * H), lambda n: (0, 0)),        # G (fused)
            pl.BlockSpec((3, W, 2 * W), lambda n: (0, 0, 0)),      # UwT stack
            pl.BlockSpec(memory_space=pltpu.MemorySpace.SMEM),     # conv bias
        ],
        out_specs=pl.BlockSpec((B, 1, 2 * H, 2 * W), lambda n: (n, 0, 0, 0)),
    )

    return pl.pallas_call(
        kernel,
        out_shape=jax.ShapeDtypeStruct((N, 1, 2 * H, 2 * W), jnp.float32),
        grid_spec=grid_spec,
        compiler_params=pltpu.CompilerParams(
            dimension_semantics=("parallel",),
            vmem_limit_bytes=int(budget)),
    )(x2, g, uwt, bias)


# ---------------------------------------------------------------------------
# Plain-JAX reference (same math) for correctness checking.
# ---------------------------------------------------------------------------

def _reference_forward(x, conv_w, conv_b):
    conv = jax.lax.conv_general_dilated(
        x, conv_w, window_strides=(1, 1), padding="SAME",
        dimension_numbers=("NCHW", "OIHW", "NCHW"),
        precision=jax.lax.Precision.HIGHEST) + conv_b[0]
    N, _, H, W = x.shape
    uh = jnp.asarray(_bilinear_matrix_align_corners(H, 2 * H), jnp.float32)
    uw = jnp.asarray(_bilinear_matrix_align_corners(W, 2 * W), jnp.float32)
    up = jnp.einsum("ph,nchw->ncpw", uh, conv,
                    precision=jax.lax.Precision.HIGHEST)
    up = jnp.einsum("qw,ncpw->ncpq", uw, up,
                    precision=jax.lax.Precision.HIGHEST)
    return up


if __name__ == "__main__":
    key = jax.random.PRNGKey(0)
    k_x, k_w, k_b = jax.random.split(key, 3)

    N, C, H, W = 2, 4, 16, 16  # batch, model_out_channels, spatial

    x = jax.random.normal(k_x, (N, C, H, W), dtype=jnp.float32)

    # Deterministic Conv2d(model_out_channels, 1, k=3, pad=1, bias=True) params.
    fan_in = C * 3 * 3
    bound = 1.0 / np.sqrt(fan_in)
    conv_w = jax.random.uniform(k_w, (1, C, 3, 3), jnp.float32, -bound, bound)
    conv_b = jax.random.uniform(k_b, (1,), jnp.float32, -bound, bound)

    out = residual_magnitude_forward(x, conv_w, conv_b)
    out = jax.block_until_ready(out)

    ref = _reference_forward(x, conv_w, conv_b)
    assert out.shape == (N, 1, 2 * H, 2 * W), out.shape
    # bf16 feature/weight operands (f32 accumulation) -> loosened tolerance.
    np.testing.assert_allclose(np.asarray(out), np.asarray(ref),
                               rtol=3e-2, atol=3e-2)
    print("KERNEL_OK")
</pallas_src>

<mosaic_0001>
module attributes {stable_mosaic.version = 11 : i64} {
  func.func @_fused_conv_upsample_kernel(%arg0: i32, %arg1: memref<1x64x16xbf16, #tpu.memory_space<vmem>>, %arg2: memref<96x64xbf16, #tpu.memory_space<vmem>>, %arg3: memref<3x16x32xf32, #tpu.memory_space<vmem>>, %arg4: memref<1xf32, #tpu.memory_space<smem>>, %arg5: memref<1x1x32x32xf32, #tpu.memory_space<vmem>>) attributes {dimension_semantics = [#tpu.dimension_semantics<parallel>], iteration_bounds = array<i64: 2>, scalar_prefetch = 0 : i64, scratch_operands = 0 : i64, tpu.core_type = #tpu.core_type<tc>, window_params = [{transform_indices = @transform_0, window_bounds = array<i64: 1, 64, 16>}, {pipeline_mode = #tpu.pipeline_mode<synchronous>, transform_indices = @transform_1, window_bounds = array<i64: 96, 64>}, {pipeline_mode = #tpu.pipeline_mode<synchronous>, transform_indices = @transform_2, window_bounds = array<i64: 3, 16, 32>}, {transform_indices = @transform_3, window_bounds = array<i64: 1>}, {transform_indices = @transform_4, window_bounds = array<i64: 1, 1, 32, 32>}]} {
    %c0 = arith.constant 0 : index
    %0 = memref.load %arg4[%c0] : memref<1xf32, #tpu.memory_space<smem>>
    %1 = vector.broadcast %0 : f32 to vector<32x32xf32>
    %c0_i32 = arith.constant 0 : i32
    %c1_i32 = arith.constant 1 : i32
    %2 = arith.muli %c0_i32, %c1_i32 : i32
    %c0_i32_0 = arith.constant 0 : i32
    %3 = arith.addi %c0_i32_0, %2 : i32
    %c0_1 = arith.constant 0 : index
    %c0_2 = arith.constant 0 : index
    %4 = vector.load %arg2[%c0_1, %c0_2] : memref<96x64xbf16, #tpu.memory_space<vmem>>, vector<96x64xbf16>
    %5 = arith.index_cast %3 : i32 to index
    %c0_3 = arith.constant 0 : index
    %c0_4 = arith.constant 0 : index
    %6 = vector.load %arg1[%5, %c0_3, %c0_4] : memref<1x64x16xbf16, #tpu.memory_space<vmem>>, vector<1x64x16xbf16>
    %7 = vector.shape_cast %6 : vector<1x64x16xbf16> to vector<64x16xbf16>
    %cst = arith.constant dense<0.000000e+00> : vector<96x16xf32>
    %8 = tpu.matmul %4, %7, %cst {dimension_numbers = #tpu.dot_dimension_numbers<[1], [0], [0], [1], [0, 0, 1, 1], [], []>} : vector<96x64xbf16>, vector<64x16xbf16>, vector<96x16xf32> -> vector<96x16xf32>
    %9 = vector.extract_strided_slice %8 {offsets = [0, 0], sizes = [32, 16], strides = [1, 1]} : vector<96x16xf32> to vector<32x16xf32>
    %c0_5 = arith.constant 0 : index
    %c0_6 = arith.constant 0 : index
    %c0_7 = arith.constant 0 : index
    %10 = vector.load %arg3[%c0_5, %c0_6, %c0_7] : memref<3x16x32xf32, #tpu.memory_space<vmem>>, vector<1x16x32xf32>
    %11 = vector.shape_cast %10 : vector<1x16x32xf32> to vector<16x32xf32>
    %cst_8 = arith.constant dense<0.000000e+00> : vector<32x32xf32>
    %12 = tpu.matmul %9, %11, %cst_8 {dimension_numbers = #tpu.dot_dimension_numbers<[1], [0], [0], [1], [0, 0, 1, 1], [], []>} : vector<32x16xf32>, vector<16x32xf32>, vector<32x32xf32> -> vector<32x32xf32>
    %13 = arith.addf %1, %12 : vector<32x32xf32>
    %14 = vector.extract_strided_slice %8 {offsets = [32, 0], sizes = [32, 16], strides = [1, 1]} : vector<96x16xf32> to vector<32x16xf32>
    %c1 = arith.constant 1 : index
    %c0_9 = arith.constant 0 : index
    %c0_10 = arith.constant 0 : index
    %15 = vector.load %arg3[%c1, %c0_9, %c0_10] : memref<3x16x32xf32, #tpu.memory_space<vmem>>, vector<1x16x32xf32>
    %16 = vector.shape_cast %15 : vector<1x16x32xf32> to vector<16x32xf32>
    %cst_11 = arith.constant dense<0.000000e+00> : vector<32x32xf32>
    %17 = tpu.matmul %14, %16, %cst_11 {dimension_numbers = #tpu.dot_dimension_numbers<[1], [0], [0], [1], [0, 0, 1, 1], [], []>} : vector<32x16xf32>, vector<16x32xf32>, vector<32x32xf32> -> vector<32x32xf32>
    %18 = arith.addf %13, %17 : vector<32x32xf32>
    %19 = vector.extract_strided_slice %8 {offsets = [64, 0], sizes = [32, 16], strides = [1, 1]} : vector<96x16xf32> to vector<32x16xf32>
    %c2 = arith.constant 2 : index
    %c0_12 = arith.constant 0 : index
    %c0_13 = arith.constant 0 : index
    %20 = vector.load %arg3[%c2, %c0_12, %c0_13] : memref<3x16x32xf32, #tpu.memory_space<vmem>>, vector<1x16x32xf32>
    %21 = vector.shape_cast %20 : vector<1x16x32xf32> to vector<16x32xf32>
    %cst_14 = arith.constant dense<0.000000e+00> : vector<32x32xf32>
    %22 = tpu.matmul %19, %21, %cst_14 {dimension_numbers = #tpu.dot_dimension_numbers<[1], [0], [0], [1], [0, 0, 1, 1], [], []>} : vector<32x16xf32>, vector<16x32xf32>, vector<32x32xf32> -> vector<32x32xf32>
    %23 = arith.addf %18, %22 : vector<32x32xf32>
    %24 = arith.index_cast %3 : i32 to index
    %c0_15 = arith.constant 0 : index
    %c0_16 = arith.constant 0 : index
    %c0_17 = arith.constant 0 : index
    %25 = vector.load %arg5[%24, %c0_15, %c0_16, %c0_17] : memref<1x1x32x32xf32, #tpu.memory_space<vmem>>, vector<1x1x32x32xf32>
    %26 = vector.shape_cast %25 : vector<1x1x32x32xf32> to vector<32x32xf32>
    %27 = vector.shape_cast %23 : vector<32x32xf32> to vector<1x1x32x32xf32>
    tpu.vector_store %arg5[%24, %c0_15, %c0_16, %c0_17], %27 {strides = array<i32>} : memref<1x1x32x32xf32, #tpu.memory_space<vmem>>, vector<1x1x32x32xf32>,
    %c1_i32_18 = arith.constant 1 : i32
    return
  }
  func.func @transform_0(%arg0: i32) -> (i32, i32, i32) {
    %c0_i32 = arith.constant 0 : i32
    %c0_i32_0 = arith.constant 0 : i32
    %c0_i32_1 = arith.constant 0 : i32
    return %arg0, %c0_i32, %c0_i32_0 : i32, i32, i32
  }
  func.func @transform_1(%arg0: i32) -> (i32, i32) {
    %c0_i32 = arith.constant 0 : i32
    %c0_i32_0 = arith.constant 0 : i32
    %c0_i32_1 = arith.constant 0 : i32
    return %c0_i32, %c0_i32_0 : i32, i32
  }
  func.func @transform_2(%arg0: i32) -> (i32, i32, i32) {
    %c0_i32 = arith.constant 0 : i32
    %c0_i32_0 = arith.constant 0 : i32
    %c0_i32_1 = arith.constant 0 : i32
    %c0_i32_2 = arith.constant 0 : i32
    return %c0_i32, %c0_i32_0, %c0_i32_1 : i32, i32, i32
  }
  func.func @transform_3(%arg0: i32) -> i32 {
    %c0_i32 = arith.constant 0 : i32
    %c0_i32_0 = arith.constant 0 : i32
    return %c0_i32 : i32
  }
  func.func @transform_4(%arg0: i32) -> (i32, i32, i32, i32) {
    %c0_i32 = arith.constant 0 : i32
    %c0_i32_0 = arith.constant 0 : i32
    %c0_i32_1 = arith.constant 0 : i32
    %c0_i32_2 = arith.constant 0 : i32
    return %arg0, %c0_i32, %c0_i32_0, %c0_i32_1 : i32, i32, i32, i32
  }
}

</mosaic_0001>

<bundles_post_ra>
// kernel: tpu_custom_call.1
= control target key start
LH: loop header
LB: loop body
LE: loop exit
PB: predicated region body
PF: predicated region fallthrough
CT: control target
= control target key end

     0   :  { %s1222_s0 = inlined_call_operand.vmem [shape: bf16[2,64,16], index: 0, kind: input, shape index: {}]   ;;  %s1223_s1 = inlined_call_operand.vmem [shape: bf16[96,64], index: 1, kind: input, shape index: {}]   ;;  %s1224_s2 = inlined_call_operand.vmem [shape: f32[3,16,32], index: 2, kind: input, shape index: {}]   ;;  %s1225_s3 = inlined_call_operand.<no memory space> [shape: f32[1], index: 3, kind: input, shape index: {}]   ;;  %s1226_s4 = inlined_call_operand.hbm [shape: f32[2,1,32,32], index: 4, kind: output, shape index: {}]  }
   0x1   :  { %9 = sst [smem:[#allocation2]] %s1225_s3 }
   0x2   :  { %10 = vsyncpa [#allocation4], 0 }
   0x3   :  { %12 = vsyncpa [#allocation4 + $0x1], 0  ;;  %s1061_s17 = smov 0   ;;  %s1063_s18 = smov 0  }
   0x4   :  { %s1065_s19 = smov 0   ;;  %s1067_s20 = smov 0  }
   0x5 LB: > { %s1082_s3 = sadd.s32 4294967295, %s1028_s20   ;;  %s767_s21 = sadd.s32 4294967294, %s1028_s20   ;;  %s1028_s20 = sphi %s1067_s20, %s1232_s20   ;;  %s1024_s19 = sphi %s1065_s19, %s1231_s19   ;;  %s1020_s18 = sphi %s1063_s18, %s1230_s18   ;;  %s1016_s17 = sphi %s1061_s17, %s1229_s17  }
   0x6   : > { %s1086_s22 = sadd.s32 1, %s1028_s20   ;;  %s114_s23 = sadd.s32 1, %s1024_s19 }
   0x7   : > { %s111_s24 = ssub.s32 %s1028_s20, %s1086_s22  ;;  %p124_p0 = scmp.ne.s32.totalorder %s1024_s19, %s1020_s18 }
   0x8   : > { %p112_p1 = scmp.eq.s32.totalorder %s111_s24, 0  ;;  %p125_p2 = scmp.eq.s32.totalorder %s1082_s3, 1 }
   0x9   : > { %p130_p3 = scmp.ne.s32.totalorder %s1020_s18, %s1016_s17  ;;  %p131_p4 = scmp.eq.s32.totalorder %s767_s21, 1 }
   0xa   : > { %s1097_s25 = scalar_select %p112_p1, %s1024_s19, %s114_s23  }
   0xb   : > { %p1099_p5 = por %p125_p2, %p124_p0  ;;  %p1103_p6 = por %p131_p4, %p130_p3 }
   0xc   : > { %p770_p7 = scmp.ge.s32.totalorder %s1028_s20, 1  ;;  %p166_p8 = scmp.lt.s32.totalorder %s1028_s20, 3 }
   0xe   : > { %p167_p9 = pnand %p770_p7, %p166_p8 }
   0xf   : > { %p192_p10 = scmp.lt.s32.totalorder (!%p167_p9), %s1082_s3, 1  ;;  %v960_v0 = vld [vmem:[%s1223_s1] sm:$0xff] (!%p167_p9)   ;;  %vm274_vm0 = vcmask (!%p167_p9), 523264   ;;  %v375_v5 = vld [vmem:[%s1224_s2 + $0x8] sm:$0xff] (!%p167_p9)  ;;  %v962_v9 = vld [vmem:[%s1223_s1 + $0x10] sm:$0xff] (!%p167_p9)   ;;  %vm376_vm1 = vcmask (!%p167_p9), 130048  }
  0x10   : > { %170 = sbr.rel (%p167_p9) target bundleno = 509 (0x1fd), region = 36  ;;  %849 = vmatprep.mubr.msk.bf16.mxu0 (!%p167_p9), %vm274_vm0, %v960_v0  ;;  %v374_v4 = vld [vmem:[%s1224_s2] sm:$0xff] (!%p167_p9)  ;;  %v961_v8 = vld [vmem:[%s1223_s1 + $0x8] sm:$0xff] (!%p167_p9)   ;;  %v963_v10 = vld [vmem:[%s1223_s1 + $0x18] sm:$0xff] (!%p167_p9)   ;;  %s198_s13 = sld [smem:[#allocation2]] (!%p167_p9)  ;;  %vm686_vm2 = vcmask (!%p167_p9), 261120  }
  0x11   : > { %v891_v6 = vpack.c.bf16 (!%p167_p9), %v375_v5, %v374_v4  ;;  %v964_v11 = vld [vmem:[%s1223_s1 + $0x20] sm:$0xff] (!%p167_p9)   ;;  %v965_v12 = vld [vmem:[%s1223_s1 + $0x28] sm:$0xff] (!%p167_p9)   ;;  %v794_v13 = vld [vmem:[%s1224_s2 + $0x10] sm:$0xff] (!%p167_p9)  ;;  %s189_s14 = sand.u32 (!%p167_p9), 1, %s1020_s18   ;;  %s812_s23 = sshll.u32 (!%p167_p9), %s1082_s3, 9 }
  0x12   : > { %v795_v14 = vld [vmem:[%s1224_s2 + $0x18] sm:$0xff] (!%p167_p9)  ;;  %v800_v16 = vld [vmem:[%s1224_s2 + $0x20] sm:$0xff] (!%p167_p9)  ;;  %v801_v17 = vld [vmem:[%s1224_s2 + $0x28] sm:$0xff] (!%p167_p9)  ;;  %s771_s15 = sshll.u32 (!%p167_p9), %s189_s14, 5  ;;  %s1177_s29 = scalar_lea.hbm (!%p167_p9), %s1226_s4, %s812_s23 }
  0x13   : > { %892 = vmatprep.subr.bf16.mxu1 (!%p167_p9), %v891_v6  ;;  %v895_v15 = vpack.c.bf16 (!%p167_p9), %v795_v14, %v794_v13  ;;  %v899_v21 = vpack.c.bf16 (!%p167_p9), %v801_v17, %v800_v16  ;;  %s191_s16 = scalar_lea.vmem (!%p167_p9), [#allocation3], %s771_s15 }
  0x14   : > { %894 = vmatpush3.bf16.msra.mxu1 (!%p167_p9), %v891_v6  ;;  %s705_s21 = sshll.u32 (!%p167_p9), %s191_s16, 4  ;;  %s1172_s21 = int_to_ptr.vmem [resolvable:$true] %s705_s21 }
  0x15   : > { %896 = vmatprep.subr.bf16.mxu1 (!%p167_p9), %v895_v15 }
  0x16   : > { %v199_v31 = vstv (!%p167_p9), %s198_s13 }
  0x17   : > { %s193_s30 = scalar_select %p192_p10, %s1082_s3, 1 }
  0x18   : > { %s1181_s3 = scalar_lea.sflag [#allocation4], %s189_s14 }
  0x19   : > { %s811_s5 = sshll.u32 %s193_s30, 5  ;;  %s966_s30 = scalar_lea.vmem %s1172_s21, 512 }
  0x1a   : > { %s196_s8 = scalar_lea.vmem %s1222_s0, %s811_s5  ;;  %p967_p11 = scmp.ne.s32.totalorder %s1172_s21, %s966_s30 }
  0x1b   : > { %v956_v1 = vld [vmem:[%s196_s8] sm:$0xff]   ;;  %v957_v2 = vld [vmem:[%s196_s8 + $0x8] sm:$0xff]   ;;  %v958_v3 = vld [vmem:[%s196_s8 + $0x10] sm:$0xff]   ;;  %s1030_s5 = smov [#allocation3]  }
  0x1c   : > { %841 = vmatprep.subr.bf16.mxu0 %v956_v1  ;;  %v959_v7 = vld [vmem:[%s196_s8 + $0x18] sm:$0xff]   ;;  %p968_p12 = pnand %p967_p11, %p1099_p5  ;;  %s970_s6 = sshll.u32 %s1030_s5, 4  ;;  %s971_s6 = int_to_ptr.vmem [resolvable:$false] %s970_s6 }
  0x1d   : > { %842 = vmatpush3.bf16.msra.mxu0 %v956_v1  ;;  %s972_s7 = scalar_lea.vmem %s971_s6, 1024  ;;  %p973_p0 = scmp.lt.s32.totalorder %s1172_s21, %s971_s6 }
  0x1e   : > { %843 = vmatprep.subr.bf16.mxu0 %v957_v2  ;;  %p969_p13 = pneg %p968_p12  ;;  %p974_p1 = scmp.lt.s32.totalorder %s972_s7, %s966_s30 }
  0x20   : > { %p975_p2 = por %p974_p1, %p973_p0 }
  0x21   : > { %844 = vmatpush3.bf16.msra.mxu0 %v957_v2 }
  0x22   : > { %845 = vmatprep.subr.bf16.mxu0 %v958_v3  ;;  %p976_p3 = pnand %p975_p2, %p969_p13 }
  0x25   : > { %846 = vmatpush3.bf16.msra.mxu0 %v958_v3 }
  0x26   : > { %847 = vmatprep.subr.bf16.mxu0 %v959_v7 }
  0x29   : > { %848 = vmatpush3.bf16.msra.mxu0 %v959_v7 }
  0x2c   : > { %850 = vmatmul.mubr.msk.bf16.vlgmr.msra.gmra.mrb[0].mxu0 %vm274_vm0, %v961_v8 }
  0x2d   : > { %853 = vmatprep.mubr.msk.bf16.mxu0 %vm274_vm0, %v962_v9 }
  0x34   : > { %854 = vmatmul.mubr.msk.bf16.gmra.mrb[4].mxu0 %vm274_vm0, %v963_v10 }
  0x35   : > { %857 = vmatprep.mubr.msk.bf16.mxu0 %vm274_vm0, %v964_v11 }
  0x3c   : > { %858 = vmatmul.mubr.msk.bf16.gmra.mrb[8].mxu0 %vm274_vm0, %v965_v12 }
  0xff   : > { %v851_v18 = vpop.f32.mrb[0].mxu0 }
 0x100   : > { %v327_v19 = vpop.f32.mrb[1].mxu0 }
 0x101   : > { %v852_v20 = vpop.f32.mrb[2].mxu0  ;;  %865 = vmatprep.mubr.msk.f32.mxu1 %vm376_vm1, %v327_v19 }
 0x102   : > { %v330_v22 = vpop.f32.mrb[3].mxu0 }
 0x103   : > { %866 = vmatmul.mubr.msk.f32.vlgmr.msra.gmra.mrb[0].mxu1 %vm376_vm1, %v330_v22 }
 0x104   : > { %898 = vmatpush3.bf16.msra.mxu1 %v895_v15  ;;  %868 = vmatprep.mubr.msk.f32.mxu1 %vm376_vm1, %v851_v18 }
 0x105   : > { %900 = vmatprep.subr.bf16.mxu1 %v899_v21 }
 0x107   : > { %v855_v23 = vpop.f32.mrb[4].mxu0  ;;  %869 = vmatmul.mubr.msk.f32.gmra.mrb[2].mxu1 %vm376_vm1, %v852_v20 }
 0x108   : > { %v343_v24 = vpop.f32.mrb[5].mxu0 }
 0x109   : > { %v856_v25 = vpop.f32.mrb[6].mxu0  ;;  %875 = vmatprep.mubr.msk.f32.mxu1 %vm376_vm1, %v343_v24 }
 0x10a   : > { %v346_v26 = vpop.f32.mrb[7].mxu0 }
 0x10b   : > { %876 = vmatmul.mubr.msk.f32.vlgmr.msra.gmra.mrb[0].mxu1 %vm376_vm1, %v346_v26 }
 0x10c   : > { %902 = vmatpush3.bf16.msra.mxu1 %v899_v21  ;;  %878 = vmatprep.mubr.msk.f32.mxu1 %vm376_vm1, %v855_v23 }
 0x10f   : > { %v859_v27 = vpop.f32.mrb[8].mxu0  ;;  %879 = vmatmul.mubr.msk.f32.gmra.mrb[2].mxu1 %vm376_vm1, %v856_v25 }
 0x110   : > { %v359_v28 = vpop.f32.mrb[9].mxu0 }
 0x111   : > { %v860_v29 = vpop.f32.mrb[10].mxu0  ;;  %885 = vmatprep.mubr.msk.f32.mxu1 %vm376_vm1, %v359_v28 }
 0x112   : > { %v362_v30 = vpop.f32.mrb[11].mxu0 }
 0x113   : > { %886 = vmatmul.mubr.msk.f32.vlgmr.msra.gmra.mrb[0].mxu1 %vm376_vm1, %v362_v30 }
 0x114   : > { %888 = vmatprep.mubr.msk.f32.mxu1 %vm376_vm1, %v859_v27 }
 0x117   : > { %889 = vmatmul.mubr.msk.f32.gmra.mrb[2].mxu1 %vm376_vm1, %v860_v29 }
 0x1e6   : > { %v887_v32 = vpop.f32.mrb[0].mxu1 }
 0x1e7   : > { %v903_v33 = vadd.f32 %v887_v32, %v199_v31  ;;  %v663_v34 = vpop.f32.mrb[1].mxu1 }
 0x1e8   : > { %v904_v35 = vadd.f32 %v663_v34, %v199_v31 }
 0x1e9   : > { %688 = vst.msk [vmem:[%s191_s16 + $0x8] sm:$0xff] %vm686_vm2, %v903_v33 }
 0x1ea   : > { %687 = vst.msk [vmem:[%s191_s16] sm:$0xff] %vm686_vm2, %v904_v35  ;;  %v890_v36 = vpop.f32.mrb[2].mxu1 }
 0x1eb   : > { %v905_v37 = vadd.f32 %v890_v36, %v199_v31  ;;  %v673_v38 = vpop.f32.mrb[3].mxu1 }
 0x1ec   : > { %v906_v39 = vadd.f32 %v673_v38, %v199_v31 }
 0x1ed   : > { %690 = vst.msk [vmem:[%s191_s16 + $0x18] sm:$0xff] %vm686_vm2, %v905_v37 }
 0x1ee   : > { %689 = vst.msk [vmem:[%s191_s16 + $0x10] sm:$0xff] %vm686_vm2, %v906_v39 }
 0x1ef   : > { %979 = shalt.err (!%p976_p3)
}
 0x1f0   : > { %s980_s8 = scalar_lea.hbm %s1177_s29, 512  ;;  %s984_s11 = scalar_lea.hbm %s1226_s4, 1024 }
 0x1f1   : > { %p981_p4 = scmp.ne.s32.totalorder %s1177_s29, %s980_s8  ;;  %p985_p9 = scmp.lt.u32.totalorder %s1177_s29, %s1226_s4 }
 0x1f2   : > { %p986_p10 = scmp.lt.u32.totalorder %s984_s11, %s980_s8  ;;  %p988_p12 = scmp.lt.u32.totalorder %s980_s8, %s1177_s29 }
 0x1f3   : > { %p982_p7 = pnand %p981_p4, %p1099_p5 }
 0x1f4   : > { %p987_p11 = por %p986_p10, %p985_p9 }
 0x1f5   : > { %p983_p8 = pneg %p982_p7 }
 0x1f6   : > { %p989_p13 = por %p988_p12, %p987_p11 }
 0x1f8   : > { %p990_p0 = pnand %p989_p13, %p983_p8 }
 0x1fa   : > { %993 = shalt.err (!%p990_p0)
}
 0x1fb   : > { %s1031_s14 = smov 128   ;;  %s1032_s15 = smov 8  }
 0x1fc   : > { %915 = dma.vmem_to_hbm [thread:$0]  (%p1099_p5), %s1172_s21, 512, %s1177_s29, %s1181_s3, %s1031_s14, %s1031_s14, %s1032_s15  }
 0x1fd PF: > { %p921_p1 = scmp.ge.s32.totalorder %s1028_s20, 2  ;;  %s720_s16 = sand.u32 1, %s1016_s17  }
 0x1fe   : > { %s721_s23 = scalar_lea.sflag [#allocation4], %s720_s16 }
 0x1ff   : > { %p918_p2 = pnand %p921_p1, %p1103_p6 }
 0x201   : > { %1011 = dma.done.wait (!%p918_p2), %s721_s23, 512  }
 0x202   : > { %1013 = vsyncadd (!%p918_p2), %s721_s23, 4294966784  ;;  %p15_p3 = scmp.ge.s32.totalorder %s1086_s22, 4   ;;  %s1229_s17 = smov %s1020_s18 }
 0x203   : > { %s1230_s18 = smov %s1024_s19  ;;  %s1231_s19 = smov %s1097_s25 }
 0x204   : > { %s1232_s20 = smov %s1086_s22  ;;  %17 = sbr.rel (!%p15_p3) target bundleno = 5 (0x5), region = 73 }
 0x20b   :  { %726 = vsyncpa [#allocation4], 1 }
 0x20c   :  { %728 = vsyncpa [#allocation4 + $0x1], 1 }

</bundles_post_ra>
